<compile_context>
chip_gen: v7x
topology: tpu7x:2x2x1
jax: 0.10.0
libtpu: 0.0.40
codegen_flags: <defaults>
</compile_context>

<pallas_src>
import jax
import jax.numpy as jnp
from jax.experimental import pallas as pl
from jax.experimental.pallas import tpu as pltpu

_LANES = 128  # vreg lane width


def wf_kernel(state_ref, a_ref, out_ref):
    # state_ref / a_ref / out_ref: (1, n_pad) f32, feature axis on lanes.
    # Multiply on the VPU, exp on the EUP (separate bundle slot).
    out_ref[...] = jnp.exp(-2.0 * a_ref[...] * state_ref[...])


def wf_forward(state, a, b, W):
    """state: (n_vis,), a: (n_vis,), b: (n_hid,), W: (n_vis, n_hid) -> (n_vis+1,).

    b and W are accepted for API fidelity with the PyTorch module but are not
    used: the log-cosh(thetahp) - log-cosh(thetah) term is identically zero
    because `thetahp` aliases `thetah` in the original forward.
    """
    del b, W  # provably cancelled by the PyTorch in-place aliasing
    n_vis = state.shape[0]
    n_out = n_vis + 1
    n_pad = ((n_out + _LANES - 1) // _LANES) * _LANES  # lane-dense output slab

    # Shift one lane right so lane 0 is 0 -> exp(0) == 1.0 (the `lg.insert(0, 0)`),
    # and zero-pad the tail lanes (exp(0) there too; sliced off in the wrapper).
    state_pad = (
        jnp.zeros((1, n_pad), jnp.float32).at[0, 1:n_out].set(state.astype(jnp.float32))
    )
    a_pad = jnp.zeros((1, n_pad), jnp.float32).at[0, 1:n_out].set(a.astype(jnp.float32))

    out = pl.pallas_call(
        wf_kernel,
        out_shape=jax.ShapeDtypeStruct((1, n_pad), jnp.float32),
        in_specs=[
            pl.BlockSpec(memory_space=pltpu.MemorySpace.VMEM),
            pl.BlockSpec(memory_space=pltpu.MemorySpace.VMEM),
        ],
        out_specs=pl.BlockSpec(memory_space=pltpu.MemorySpace.VMEM),
    )(state_pad, a_pad)

    return out[0, :n_out]


if __name__ == "__main__":
    n_vis, n_hid = 16, 32

    key = jax.random.PRNGKey(0)
    k_state, k_a, k_b, k_w = jax.random.split(key, 4)

    # Deterministic synthetic parameters matching the module's __init__ signature.
    state = jnp.sign(jax.random.normal(k_state, (n_vis,), jnp.float32))  # spin-like
    a = 0.1 * jax.random.normal(k_a, (n_vis,), jnp.float32)
    b = 0.1 * jax.random.normal(k_b, (n_hid,), jnp.float32)
    W = 0.1 * jax.random.normal(k_w, (n_vis, n_hid), jnp.float32)

    out = wf_forward(state, a, b, W)
    out = jax.block_until_ready(out)

    # Reference: the PyTorch forward reduces exactly to exp([0, -2*a*state]).
    ref = jnp.exp(jnp.concatenate([jnp.zeros((1,), jnp.float32), -2.0 * a * state]))
    assert out.shape == (n_vis + 1,)
    assert jnp.allclose(out, ref, rtol=1e-5, atol=1e-5)
    assert jnp.allclose(out[0], 1.0)

    print("KERNEL_OK")
</pallas_src>

<mosaic_0001>
module attributes {stable_mosaic.version = 11 : i64} {
  func.func @wf_kernel(%arg0: memref<1x128xf32, #tpu.memory_space<vmem>>, %arg1: memref<1x128xf32, #tpu.memory_space<vmem>>, %arg2: memref<1x128xf32, #tpu.memory_space<vmem>>) attributes {dimension_semantics = [], scalar_prefetch = 0 : i64, scratch_operands = 0 : i64, tpu.core_type = #tpu.core_type<tc>} {
    %c0 = arith.constant 0 : index
    %c0_0 = arith.constant 0 : index
    %0 = vector.load %arg1[%c0, %c0_0] : memref<1x128xf32, #tpu.memory_space<vmem>>, vector<1x128xf32>
    %cst = arith.constant -2.000000e+00 : f32
    %1 = vector.broadcast %cst : f32 to vector<1x128xf32>
    %2 = arith.mulf %1, %0 : vector<1x128xf32>
    %c0_1 = arith.constant 0 : index
    %c0_2 = arith.constant 0 : index
    %3 = vector.load %arg0[%c0_1, %c0_2] : memref<1x128xf32, #tpu.memory_space<vmem>>, vector<1x128xf32>
    %4 = arith.mulf %2, %3 : vector<1x128xf32>
    %5 = math.exp %4 : vector<1x128xf32>
    %c0_3 = arith.constant 0 : index
    %c0_4 = arith.constant 0 : index
    %6 = vector.load %arg2[%c0_3, %c0_4] : memref<1x128xf32, #tpu.memory_space<vmem>>, vector<1x128xf32>
    tpu.vector_store %arg2[%c0_3, %c0_4], %5 {strides = array<i32>} : memref<1x128xf32, #tpu.memory_space<vmem>>, vector<1x128xf32>,
    return
  }
}

</mosaic_0001>

<bundles_post_ra>
// kernel: tpu_custom_call.1
= control target key start
LH: loop header
LB: loop body
LE: loop exit
PB: predicated region body
PF: predicated region fallthrough
CT: control target
= control target key end

     0   :  { %7 = vsyncpa [#allocation3], 0  ;;  %s142_s0 = inlined_call_operand.hbm [shape: f32[1,128], index: 0, kind: input, shape index: {}]   ;;  %s143_s1 = inlined_call_operand.vmem [shape: f32[1,128], index: 1, kind: input, shape index: {}]   ;;  %s144_s2 = inlined_call_operand.hbm [shape: f32[1,128], index: 2, kind: output, shape index: {}]  }
   0x1   :  { %8 = vsyncpa [#allocation4], 0  ;;  %s98_s9 = smov [#allocation2]   ;;  %s50_s13 = scalar_lea.hbm %s142_s0, 16 }
   0x2   :  { %s15_s10 = sshll.u32 %s98_s9, 4  ;;  %p51_p0 = scmp.ne.s32.totalorder %s142_s0, %s50_s13  ;;  %s16_s10 = int_to_ptr.vmem [resolvable:$true] %s15_s10 }
   0x3   :  { %p54_p1 = scmp.lt.u32.totalorder %s50_s13, %s142_s0 }
   0x5   :  { %p56_p2 = pnand %p54_p1, %p51_p0 }
   0x7   :  { %59 = shalt.err (!%p56_p2)
}
   0x8   :  { %s60_s18 = scalar_lea.vmem %s16_s10, 16  ;;  %s64_s19 = scalar_lea.vmem %s16_s10, 32 }
   0x9   :  { %p61_p3 = scmp.ne.s32.totalorder %s16_s10, %s60_s18  ;;  %p65_p4 = scmp.lt.s32.totalorder %s16_s10, %s16_s10 }
   0xa   :  { %p66_p5 = scmp.lt.s32.totalorder %s64_s19, %s60_s18 }
   0xc   :  { %p67_p6 = por %p66_p5, %p65_p4 }
   0xe   :  { %p68_p7 = pnand %p67_p6, %p61_p3 }
  0x10   :  { %71 = shalt.err (!%p68_p7)
}
  0x11   :  { %18 = dma.hbm_to_vmem [thread:$0]  %s142_s0, 16, %s16_s10, [#allocation3]  }
  0x12   :  { %94 = dma.done.wait [#allocation3], 16  }
  0x13   :  { %95 = vsyncadd [#allocation3], 4294967280  ;;  %v24_v0 = vld [vmem:[%s143_s1] sm:$0x1]  ;;  %s99_s24 = smov [#allocation5]  }
  0x14   :  { %v26_v1 = vld [vmem:[#allocation2] sm:$0x1]  ;;  %v25_v2 = vmul.f32 -2.0, %v24_v0  ;;  %s37_s25 = sshll.u32 %s99_s24, 4  ;;  %s38_s25 = int_to_ptr.vmem [resolvable:$true] %s37_s25 }
  0x15   :  { %s72_s26 = scalar_lea.vmem %s38_s25, 16  ;;  %s76_s27 = scalar_lea.vmem %s38_s25, 32 }
  0x16   :  { %v27_v3 = vmul.f32 %v26_v1, %v25_v2  ;;  %p73_p8 = scmp.ne.s32.totalorder %s38_s25, %s72_s26  ;;  %p77_p9 = scmp.lt.s32.totalorder %s38_s25, %s38_s25 }
  0x17   :  { %p78_p10 = scmp.lt.s32.totalorder %s76_s27, %s72_s26 }
  0x18   :  { %v28_v4 = vmul.f32 1.442695, %v27_v3 }
  0x19   :  { %p79_p11 = por %p78_p10, %p77_p9 }
  0x1a   :  { %48 = vpow2.f32 %v28_v4 }
  0x1b   :  { %p80_p12 = pnand %p79_p11, %p73_p8 }
  0x24   :  { %v49_v5 = vpop.eup %48 }
  0x25   :  { %30 = vst [vmem:[#allocation5] sm:$0x1] %v49_v5 }
  0x26   :  { %83 = shalt.err (!%p80_p12)
}
  0x27   :  { %s84_s28 = scalar_lea.hbm %s144_s2, 16 }
  0x28   :  { %p85_p13 = scmp.ne.s32.totalorder %s144_s2, %s84_s28  ;;  %p88_p0 = scmp.lt.u32.totalorder %s84_s28, %s144_s2 }
  0x2a   :  { %p90_p1 = pnand %p88_p0, %p85_p13 }
  0x2c   :  { %93 = shalt.err (!%p90_p1)
}
  0x2d   :  { %40 = dma.vmem_to_hbm [thread:$0]  %s38_s25, 16, %s144_s2, [#allocation4]  }
  0x2e   :  { %96 = dma.done.wait [#allocation4], 16  }
  0x2f   :  { %97 = vsyncadd [#allocation4], 4294967280 }
  0x30   :  { %44 = vsyncpa [#allocation3], 1 }
  0x31   :  { %45 = vsyncpa [#allocation4], 1 }

</bundles_post_ra>
